<compile_context>
chip_gen: v6e
topology: v6e:2x2x1
jax: 0.10.0
libtpu: 0.0.40
codegen_flags: <defaults>
</compile_context>

<pallas_src>
import functools

import numpy as np
import jax
import jax.numpy as jnp
from jax.experimental import pallas as pl
from jax.experimental.pallas import tpu as pltpu


def _conv_lrelu_kernel(x_ref, mask_ref, w_ref, b_ref, o_ref, *, shifts, neg_slope):
    """One batch element per grid step.

    x_ref:    (1, C_in, H*W)       bf16, lane-dense flattened NCHW input
    mask_ref: (K*K*C_in, H*W)      f32 0/1 halo mask (rows ordered (kh, kw, ci))
    w_ref:    (K*K*C_in, C_out)    bf16 reshaped weights (rows ordered (kh, kw, ci))
    b_ref:    (1, C_out)           f32 bias
    o_ref:    (1, H*W, C_out)      f32 output block (reshaped to NHWC outside)
    """
    # Upcast once; roll / concat / mask stay in f32 (v5e has no bf16 VPU path).
    x = x_ref[0].astype(jnp.float32)                            # (C_in, HW)

    # im2col: each (kh, kw) tap is a static XLU lane rotation of the flat image.
    taps = [pltpu.roll(x, shift=s, axis=1) if s else x for s in shifts]
    p_t = jnp.concatenate(taps, axis=0) * mask_ref[...]         # (K*K*C_in, HW)

    # Single MXU matmul (bf16 operands, f32 accumulation), contraction dim = 36.
    acc = jax.lax.dot_general(
        p_t.astype(jnp.bfloat16), w_ref[...],
        dimension_numbers=(((0,), (0,)), ((), ())),
        preferred_element_type=jnp.float32)                     # (HW, C_out) f32

    acc = acc + b_ref[...]                                      # bias (f32)
    acc = jnp.where(acc >= 0, acc, neg_slope * acc)             # LeakyReLU (f32)
    o_ref[0] = acc.astype(o_ref.dtype)


@functools.partial(jax.jit, static_argnames=("kernel_size", "neg_slope"))
def input_projection(x_nchw, weight, bias, *, kernel_size=3, neg_slope=0.01):
    """Forward pass of InputProjection.

    x_nchw:  (B, C_in, H, W)      f32 (PyTorch NCHW input)
    weight:  (C_out, C_in, K, K)  f32 (PyTorch OIHW conv weight)
    bias:    (C_out,)             f32
    returns: (B, H, W, C_out)     f32 NHWC (== PyTorch output after permute(0,2,3,1))
    """
    B, C_in, H, W = x_nchw.shape
    C_out = weight.shape[0]
    K = kernel_size
    pad = K // 2
    HW = H * W
    KKC = K * K * C_in

    # ---- cheap / free glue only: dtype cast + free reshapes (no transpose/pad of x)
    x2 = x_nchw.astype(jnp.bfloat16).reshape(B, C_in, HW)            # free reshape
    w2 = (jnp.transpose(weight, (2, 3, 1, 0))                        # (kh,kw,ci,co)
          .reshape(KKC, C_out).astype(jnp.bfloat16))
    b2 = bias.reshape(1, C_out).astype(jnp.float32)

    # Static per-tap lane shifts and halo masks (trace-time numpy constants).
    shifts = []
    mask_np = np.zeros((KKC, HW), dtype=np.float32)
    for kh in range(K):
        for kw_ in range(K):
            dh, dw = kh - pad, kw_ - pad
            shifts.append((-(dh * W + dw)) % HW)
            m = np.zeros((H, W), dtype=np.float32)
            m[max(0, -dh):H - max(0, dh), max(0, -dw):W - max(0, dw)] = 1.0
            t = kh * K + kw_
            mask_np[t * C_in:(t + 1) * C_in, :] = m.reshape(1, HW)
    mask = jnp.asarray(mask_np, dtype=jnp.float32)

    kernel = functools.partial(
        _conv_lrelu_kernel, shifts=tuple(shifts), neg_slope=neg_slope)

    out = pl.pallas_call(
        kernel,
        out_shape=jax.ShapeDtypeStruct((B, HW, C_out), jnp.float32),
        grid_spec=pltpu.PrefetchScalarGridSpec(
            num_scalar_prefetch=0,
            grid=(B,),
            in_specs=[
                pl.BlockSpec((1, C_in, HW), lambda b: (b, 0, 0)),   # x (lane-dense)
                pl.BlockSpec((KKC, HW), lambda b: (0, 0)),          # halo mask
                pl.BlockSpec((KKC, C_out), lambda b: (0, 0)),       # weights (2D)
                pl.BlockSpec((1, C_out), lambda b: (0, 0)),         # bias
            ],
            out_specs=pl.BlockSpec((1, HW, C_out), lambda b: (b, 0, 0)),
        ),
        compiler_params=pltpu.CompilerParams(
            dimension_semantics=("parallel",)),
    )(x2, mask, w2, b2)

    return out.reshape(B, H, W, C_out)   # free reshape to NHWC


def _reference(x_nchw, weight, bias, neg_slope=0.01):
    """Plain-JAX reference (lax.conv) on the same bf16-rounded operands."""
    xr = x_nchw.astype(jnp.bfloat16).astype(jnp.float32)
    wr = weight.astype(jnp.bfloat16).astype(jnp.float32)
    y = jax.lax.conv_general_dilated(
        xr, wr, window_strides=(1, 1), padding="SAME",
        dimension_numbers=("NCHW", "OIHW", "NCHW"),
        precision=jax.lax.Precision.HIGHEST)
    y = y + bias.reshape(1, -1, 1, 1)
    y = jnp.where(y >= 0, y, neg_slope * y)
    return jnp.transpose(y, (0, 2, 3, 1))   # NHWC, like .permute(0,2,3,1)


if __name__ == "__main__":
    # Small shapes consistent with the module's forward.
    B, C_in, H, W = 2, 4, 16, 16
    C_out, K = 32, 3

    key = jax.random.PRNGKey(0)
    kx, kwt, kb = jax.random.split(key, 3)
    x = jax.random.normal(kx, (B, C_in, H, W), dtype=jnp.float32)
    weight = jax.random.normal(kwt, (C_out, C_in, K, K), dtype=jnp.float32) * 0.1
    bias = jax.random.normal(kb, (C_out,), dtype=jnp.float32) * 0.1

    out = input_projection(x, weight, bias, kernel_size=K)
    out = jax.block_until_ready(out)

    ref = _reference(x, weight, bias)
    assert out.shape == (B, H, W, C_out), out.shape
    err = float(jnp.max(jnp.abs(out - ref)))
    assert err < 2e-3, err

    print("KERNEL_OK")
</pallas_src>

<mosaic_0001>
module attributes {stable_mosaic.version = 11 : i64} {
  func.func @_conv_lrelu_kernel(%arg0: i32, %arg1: memref<1x4x256xbf16, #tpu.memory_space<vmem>>, %arg2: memref<36x256xf32, #tpu.memory_space<vmem>>, %arg3: memref<36x32xbf16, #tpu.memory_space<vmem>>, %arg4: memref<1x32xf32, #tpu.memory_space<vmem>>, %arg5: memref<1x256x32xf32, #tpu.memory_space<vmem>>) attributes {dimension_semantics = [#tpu.dimension_semantics<parallel>], iteration_bounds = array<i64: 2>, scalar_prefetch = 0 : i64, scratch_operands = 0 : i64, tpu.core_type = #tpu.core_type<tc>, window_params = [{transform_indices = @transform_0, window_bounds = array<i64: 1, 4, 256>}, {pipeline_mode = #tpu.pipeline_mode<synchronous>, transform_indices = @transform_1, window_bounds = array<i64: 36, 256>}, {pipeline_mode = #tpu.pipeline_mode<synchronous>, transform_indices = @transform_2, window_bounds = array<i64: 36, 32>}, {pipeline_mode = #tpu.pipeline_mode<synchronous>, transform_indices = @transform_3, window_bounds = array<i64: 1, 32>}, {transform_indices = @transform_4, window_bounds = array<i64: 1, 256, 32>}]} {
    %c0 = arith.constant 0 : index
    %c0_0 = arith.constant 0 : index
    %c0_1 = arith.constant 0 : index
    %0 = vector.load %arg1[%c0, %c0_0, %c0_1] : memref<1x4x256xbf16, #tpu.memory_space<vmem>>, vector<1x4x256xbf16>
    %1 = vector.shape_cast %0 : vector<1x4x256xbf16> to vector<4x256xbf16>
    %2 = arith.extf %1 : vector<4x256xbf16> to vector<4x256xf32>
    %c17_i32 = arith.constant 17 : i32
    %3 = tpu.dynamic_rotate %2 by %c17_i32 dim 1 : vector<4x256xf32>, i32 -> vector<4x256xf32>
    %c16_i32 = arith.constant 16 : i32
    %4 = tpu.dynamic_rotate %2 by %c16_i32 dim 1 : vector<4x256xf32>, i32 -> vector<4x256xf32>
    %c15_i32 = arith.constant 15 : i32
    %5 = tpu.dynamic_rotate %2 by %c15_i32 dim 1 : vector<4x256xf32>, i32 -> vector<4x256xf32>
    %c1_i32 = arith.constant 1 : i32
    %6 = tpu.dynamic_rotate %2 by %c1_i32 dim 1 : vector<4x256xf32>, i32 -> vector<4x256xf32>
    %c255_i32 = arith.constant 255 : i32
    %7 = tpu.dynamic_rotate %2 by %c255_i32 dim 1 : vector<4x256xf32>, i32 -> vector<4x256xf32>
    %c241_i32 = arith.constant 241 : i32
    %8 = tpu.dynamic_rotate %2 by %c241_i32 dim 1 : vector<4x256xf32>, i32 -> vector<4x256xf32>
    %c240_i32 = arith.constant 240 : i32
    %9 = tpu.dynamic_rotate %2 by %c240_i32 dim 1 : vector<4x256xf32>, i32 -> vector<4x256xf32>
    %c239_i32 = arith.constant 239 : i32
    %10 = tpu.dynamic_rotate %2 by %c239_i32 dim 1 : vector<4x256xf32>, i32 -> vector<4x256xf32>
    %11 = tpu.concatenate %3, %4, %5, %6, %2, %7, %8, %9, %10 in 0 : vector<4x256xf32>, vector<4x256xf32>, vector<4x256xf32>, vector<4x256xf32>, vector<4x256xf32>, vector<4x256xf32>, vector<4x256xf32>, vector<4x256xf32>, vector<4x256xf32> -> vector<36x256xf32>
    %c0_2 = arith.constant 0 : index
    %c0_3 = arith.constant 0 : index
    %12 = vector.load %arg2[%c0_2, %c0_3] : memref<36x256xf32, #tpu.memory_space<vmem>>, vector<36x256xf32>
    %13 = arith.mulf %11, %12 : vector<36x256xf32>
    %14 = arith.truncf %13 : vector<36x256xf32> to vector<36x256xbf16>
    %c0_4 = arith.constant 0 : index
    %c0_5 = arith.constant 0 : index
    %15 = vector.load %arg3[%c0_4, %c0_5] : memref<36x32xbf16, #tpu.memory_space<vmem>>, vector<36x32xbf16>
    %cst = arith.constant dense<0.000000e+00> : vector<256x32xf32>
    %16 = tpu.matmul %14, %15, %cst {dimension_numbers = #tpu.dot_dimension_numbers<[0], [0], [1], [1], [0, 1, 1, 1], [], []>} : vector<36x256xbf16>, vector<36x32xbf16>, vector<256x32xf32> -> vector<256x32xf32>
    %c0_6 = arith.constant 0 : index
    %c0_7 = arith.constant 0 : index
    %17 = vector.load %arg4[%c0_6, %c0_7] : memref<1x32xf32, #tpu.memory_space<vmem>>, vector<1x32xf32>
    %18 = vector.broadcast %17 : vector<1x32xf32> to vector<256x32xf32>
    %19 = arith.addf %16, %18 : vector<256x32xf32>
    %cst_8 = arith.constant 0.000000e+00 : f32
    %20 = vector.broadcast %cst_8 : f32 to vector<256x32xf32>
    %21 = arith.cmpf oge, %19, %20 : vector<256x32xf32>
    %cst_9 = arith.constant 0.00999999977 : f32
    %22 = vector.broadcast %cst_9 : f32 to vector<256x32xf32>
    %23 = arith.mulf %22, %19 : vector<256x32xf32>
    %24 = arith.select %21, %19, %23 : vector<256x32xi1>, vector<256x32xf32>
    %c0_10 = arith.constant 0 : index
    %c0_11 = arith.constant 0 : index
    %c0_12 = arith.constant 0 : index
    %25 = vector.load %arg5[%c0_10, %c0_11, %c0_12] : memref<1x256x32xf32, #tpu.memory_space<vmem>>, vector<1x256x32xf32>
    %26 = vector.shape_cast %25 : vector<1x256x32xf32> to vector<256x32xf32>
    %27 = vector.shape_cast %24 : vector<256x32xf32> to vector<1x256x32xf32>
    tpu.vector_store %arg5[%c0_10, %c0_11, %c0_12], %27 {strides = array<i32>} : memref<1x256x32xf32, #tpu.memory_space<vmem>>, vector<1x256x32xf32>,
    return
  }
  func.func @transform_0(%arg0: i32) -> (i32, i32, i32) {
    %c0_i32 = arith.constant 0 : i32
    %c0_i32_0 = arith.constant 0 : i32
    %c0_i32_1 = arith.constant 0 : i32
    return %arg0, %c0_i32, %c0_i32_0 : i32, i32, i32
  }
  func.func @transform_1(%arg0: i32) -> (i32, i32) {
    %c0_i32 = arith.constant 0 : i32
    %c0_i32_0 = arith.constant 0 : i32
    %c0_i32_1 = arith.constant 0 : i32
    return %c0_i32, %c0_i32_0 : i32, i32
  }
  func.func @transform_2(%arg0: i32) -> (i32, i32) {
    %c0_i32 = arith.constant 0 : i32
    %c0_i32_0 = arith.constant 0 : i32
    %c0_i32_1 = arith.constant 0 : i32
    return %c0_i32, %c0_i32_0 : i32, i32
  }
  func.func @transform_3(%arg0: i32) -> (i32, i32) {
    %c0_i32 = arith.constant 0 : i32
    %c0_i32_0 = arith.constant 0 : i32
    %c0_i32_1 = arith.constant 0 : i32
    return %c0_i32, %c0_i32_0 : i32, i32
  }
  func.func @transform_4(%arg0: i32) -> (i32, i32, i32) {
    %c0_i32 = arith.constant 0 : i32
    %c0_i32_0 = arith.constant 0 : i32
    %c0_i32_1 = arith.constant 0 : i32
    return %arg0, %c0_i32, %c0_i32_0 : i32, i32, i32
  }
}

</mosaic_0001>

<bundles_post_ra>
// kernel: input_projection.1
= control target key start
LH: loop header
LB: loop body
LE: loop exit
PB: predicated region body
PF: predicated region fallthrough
CT: control target
= control target key end

     0   :  { %9 = vsyncpa [#allocation3], 0  ;;  %s1396_s0 = inlined_call_operand.vmem [shape: bf16[2,4,256], index: 0, kind: input, shape index: {}]   ;;  %s1397_s1 = inlined_call_operand.vmem [shape: f32[36,256], index: 1, kind: input, shape index: {}]   ;;  %s1398_s2 = inlined_call_operand.vmem [shape: bf16[36,32], index: 2, kind: input, shape index: {}]   ;;  %s1399_s3 = inlined_call_operand.vmem [shape: f32[1,32], index: 3, kind: input, shape index: {}]   ;;  %s1400_s4 = inlined_call_operand.hbm [shape: f32[2,256,32], index: 4, kind: output, shape index: {}]  }
   0x1   :  { %11 = vsyncpa [#allocation3 + $0x1], 0  ;;  %s1087_s15 = smov 0   ;;  %s1089_s16 = smov 0  }
   0x2   :  { %s1091_s17 = smov 0   ;;  %s1093_s18 = smov 0  }
   0x3 LB: > { %s1108_s19 = sadd.s32 4294967295, %s1049_s18   ;;  %s797_s20 = sadd.s32 4294967294, %s1049_s18   ;;  %s1049_s18 = sphi %s1093_s18, %s1406_s18   ;;  %s1045_s17 = sphi %s1091_s17, %s1405_s17   ;;  %s1041_s16 = sphi %s1089_s16, %s1404_s16   ;;  %s1037_s15 = sphi %s1087_s15, %s1403_s15  }
   0x4   : > { %s1112_s21 = sadd.s32 1, %s1049_s18   ;;  %s113_s22 = sadd.s32 1, %s1045_s17 }
   0x5   : > { %s110_s23 = ssub.s32 %s1049_s18, %s1112_s21  ;;  %p123_p0 = scmp.ne.s32.totalorder %s1045_s17, %s1041_s16 }
   0x6   : > { %p111_p1 = scmp.eq.s32.totalorder %s110_s23, 0  ;;  %p124_p2 = scmp.eq.s32.totalorder %s1108_s19, 1 }
   0x7   : > { %p129_p3 = scmp.ne.s32.totalorder %s1041_s16, %s1037_s15  ;;  %p130_p4 = scmp.eq.s32.totalorder %s797_s20, 1 }
   0x8   : > { %s1123_s24 = scalar_select %p111_p1, %s1045_s17, %s113_s22  }
   0x9   : > { %p1125_p5 = por %p124_p2, %p123_p0  ;;  %p1129_p6 = por %p130_p4, %p129_p3 }
   0xa   : > { %p800_p7 = scmp.ge.s32.totalorder %s1049_s18, 1  ;;  %p165_p8 = scmp.lt.s32.totalorder %s1049_s18, 3 }
   0xc   : > { %p166_p9 = pnand %p800_p7, %p165_p8 }
   0xd   : > { %p191_p10 = scmp.lt.s32.totalorder (!%p166_p9), %s1108_s19, 1  ;;  %s1051_s6 = smov (!%p166_p9), 16  }
   0xe   : > { %169 = sbr.rel (%p166_p9) target bundleno = 507 (0x1fb), region = 36  ;;  %s1052_s7 = smov (!%p166_p9), 17  }
   0xf   : > { %s1053_s8 = smov (!%p166_p9), 1   ;;  %s1054_s9 = smov (!%p166_p9), 15  }
  0x10   : > { %s1055_s10 = smov (!%p166_p9), 127   ;;  %s1056_s11 = smov (!%p166_p9), 112  }
  0x11   : > { %s1057_s22 = smov (!%p166_p9), 113   ;;  %s1058_s23 = smov (!%p166_p9), 111  }
  0x13   : > { %s192_s27 = scalar_select %p191_p10, %s1108_s19, 1  ;;  %v986_v4 = vld [vmem:[%s1398_s2 + $0x10] ss:$0 sps:$4 sm:$0x33]   ;;  %vm427_vm0 = vcmask 1041408   ;;  %v987_v5 = vld [vmem:[%s1398_s2 + $0x8] sm:$0xff]   ;;  %v206_v8 = vlaneseq }
  0x14   : > { %894 = vmatprep.subr.msk.bf16.mxu0 %vm427_vm0, %v986_v4  ;;  %895 = vmatprep.subr.msk.bf16.mxu1 %vm427_vm0, %v986_v4  ;;  %v429_v6 = vsel %vm427_vm0, %v986_v4, 0  ;;  %v988_v7 = vld [vmem:[%s1398_s2] sm:$0xff]   ;;  %vm284_vm3 = vcmask 1043456   ;;  %v294_v35 = vld [vmem:[%s1397_s1 + $0x8] sm:$0xff]  ;;  %v295_v45 = vld [vmem:[%s1397_s1 + $0x10] sm:$0xff]  ;;  %vm378_vm10 = vcmask 293888  }
  0x15   : > { %s829_s28 = sshll.u32 %s192_s27, 2  ;;  %851 = vmatpush3.bf16.msra.mxu0 %v429_v6  ;;  %891 = vmatpush3.bf16.msra.mxu1 %v429_v6  ;;  %v1157_v9 = vand.u32 127, %v206_v8  ;;  %v293_v34 = vld [vmem:[%s1397_s1] sm:$0xff]  ;;  %v296_v48 = vld [vmem:[%s1397_s1 + $0x18] sm:$0xff]  ;;  %vm688_vm11 = vcmask 261120  }
  0x16   : > { %s195_s5 = scalar_lea.vmem %s1396_s0, %s829_s28  ;;  %852 = vmatprep.subr.bf16.mxu0 %v987_v5  ;;  %889 = vmatprep.subr.bf16.mxu1 %v987_v5 }
  0x17   : > { %v197_v0 = vld [vmem:[%s195_s5] sm:$0xf]  ;;  %vm215_vm1 = vcmp.lt.s32.totalorder %v1157_v9, 16  ;;  %vm208_vm2 = vcmp.lt.s32.totalorder %v1157_v9, 17  ;;  %vm229_vm4 = vcmp.lt.s32.totalorder %v1157_v9, 1  ;;  %vm222_vm5 = vcmp.lt.s32.totalorder %v1157_v9, 15 }
  0x18   : > { %v1140_v1 = vunpack.c.l.bf16 %v197_v0  ;;  %vm236_vm6 = vcmp.lt.s32.totalorder %v1157_v9, 127  ;;  %vm250_vm7 = vcmp.lt.s32.totalorder %v1157_v9, 112  ;;  %vm243_vm8 = vcmp.lt.s32.totalorder %v1157_v9, 113  ;;  %v297_v0 = vld [vmem:[%s1397_s1 + $0x20] sm:$0xff] }
  0x19   : > { %853 = vmatpush3.bf16.msra.mxu0 %v987_v5  ;;  %892 = vmatpush3.bf16.msra.mxu1 %v987_v5  ;;  %vm257_vm9 = vcmp.lt.s32.totalorder %v1157_v9, 111 }
  0x1a   : > { %v1144_v2 = vcombine.high %v1140_v1, %v1140_v1  ;;  %854 = vmatprep.subr.bf16.mxu0 %v988_v7  ;;  %890 = vmatprep.subr.bf16.mxu1 %v988_v7 }
  0x1c   : > { %v946_v3 = vpack.i.bf16 %v1144_v2, %v1140_v1 }
  0x1d   : > { %855 = vmatpush3.bf16.msra.mxu0 %v988_v7  ;;  %893 = vmatpush3.bf16.msra.mxu1 %v988_v7  ;;  %v299_v7 = vld [vmem:[%s1397_s1 + $0x30] sm:$0xff] }
  0x1e   : > { %947 = vrot.lane.b32.xlu0 %v946_v3, %s1051_s6  ;;  %957 = vrot.lane.b32.xlu1 %v946_v3, %s1052_s7  ;;  %s188_s6 = sand.u32 1, %s1041_s16  }
  0x1f   : > { %s1356_s20 = scalar_lea.sflag [#allocation3], %s188_s6 }
  0x22   : > { %952 = vrot.lane.b32.xlu0 %v946_v3, %s1053_s8  ;;  %962 = vrot.lane.b32.xlu1 %v946_v3, %s1054_s9  ;;  %s801_s9 = sshll.u32 %s188_s6, 8 }
  0x26   : > { %967 = vrot.lane.b32.xlu0 %v946_v3, %s1055_s10  ;;  %972 = vrot.lane.b32.xlu1 %v946_v3, %s1056_s11  ;;  %s1253_s10 = scalar_lea.vmem [#allocation2], %s801_s9  ;;  %s830_s11 = sshll.u32 %s1108_s19, 12 }
  0x27   : > { %s735_s12 = sshll.u32 %s1253_s10, 4  ;;  %s1346_s14 = scalar_lea.hbm %s1400_s4, %s830_s11  ;;  %s1348_s12 = int_to_ptr.vmem [resolvable:$true] %s735_s12 }
  0x2a   : > { %977 = vrot.lane.b32.xlu0 %v946_v3, %s1057_s22  ;;  %982 = vrot.lane.b32.xlu1 %v946_v3, %s1058_s23  ;;  %v298_v3 = vld [vmem:[%s1397_s1 + $0x28] sm:$0xff]  ;;  %s989_s22 = scalar_lea.vmem %s1348_s12, 4096  ;;  %s1059_s23 = smov [#allocation2]  }
  0x2b   : > { %p990_p11 = scmp.ne.s32.totalorder %s1348_s12, %s989_s22  ;;  %s993_s27 = sshll.u32 %s1059_s23, 4  ;;  %s994_s27 = int_to_ptr.vmem [resolvable:$false] %s993_s27 }
  0x2c   : > { %s995_s28 = scalar_lea.vmem %s994_s27, 8192  ;;  %p996_p0 = scmp.lt.s32.totalorder %s1348_s12, %s994_s27 }
  0x2d   : > { %p991_p12 = pnand %p990_p11, %p1125_p5  ;;  %p997_p1 = scmp.lt.s32.totalorder %s995_s28, %s989_s22 }
  0x2f   : > { %p992_p13 = pneg %p991_p12  ;;  %p998_p2 = por %p997_p1, %p996_p0 }
  0x31   : > { %p999_p3 = pnand %p998_p2, %p992_p13 }
  0x90   : > { %v948_v10 = vpop.permute.xlu0 %947  ;;  %v958_v11 = vpop.permute.xlu1 %957 }
  0x91   : > { %v950_v12 = vunpack.i.h.bf16 %v948_v10  ;;  %v949_v13 = vunpack.i.l.bf16 %v948_v10  ;;  %v960_v14 = vunpack.i.h.bf16 %v958_v11  ;;  %v959_v15 = vunpack.i.l.bf16 %v958_v11  ;;  %v300_v10 = vld [vmem:[%s1397_s1 + $0x38] sm:$0xff] }
  0x93   : > { %v216_v16 = vsel %vm215_vm1, %v949_v13, %v950_v12  ;;  %v217_v17 = vsel %vm215_vm1, %v950_v12, %v949_v13  ;;  %v209_v18 = vsel %vm208_vm2, %v959_v15, %v960_v14  ;;  %v210_v19 = vsel %vm208_vm2, %v960_v14, %v959_v15 }
  0x94   : > { %v262_v20 = vrot.slane %v217_v17, 4  ;;  %v263_v21 = vrot.slane %v216_v16, 4  ;;  %v953_v22 = vpop.permute.xlu0 %952  ;;  %v963_v23 = vpop.permute.xlu1 %962 }
  0x95   : > { %v955_v24 = vunpack.i.h.bf16 %v953_v22  ;;  %v954_v25 = vunpack.i.l.bf16 %v953_v22  ;;  %v965_v26 = vunpack.i.h.bf16 %v963_v23  ;;  %v964_v27 = vunpack.i.l.bf16 %v963_v23 }
  0x96   : > { %v285_v28 = vsel %vm284_vm3, %v210_v19, %v262_v20  ;;  %v286_v29 = vsel %vm284_vm3, %v209_v18, %v263_v21  ;;  %v302_v18 = vld [vmem:[%s1397_s1 + $0x48] sm:$0xf] }
  0x97   : > { %v230_v30 = vsel %vm229_vm4, %v954_v25, %v955_v24  ;;  %v231_v31 = vsel %vm229_vm4, %v955_v24, %v954_v25  ;;  %v223_v32 = vsel %vm222_vm5, %v964_v27, %v965_v26  ;;  %v224_v33 = vsel %vm222_vm5, %v965_v26, %v964_v27 }
  0x98   : > { %v268_v36 = vrot.slane %v231_v31, 4  ;;  %v269_v37 = vrot.slane %v230_v30, 4  ;;  %v968_v38 = vpop.permute.xlu0 %967  ;;  %v973_v39 = vpop.permute.xlu1 %972  ;;  %v303_v46 = vmul.f32 %v293_v34, %v285_v28  ;;  %v304_v49 = vmul.f32 %v294_v35, %v286_v29 }
  0x99   : > { %v970_v40 = vunpack.i.h.bf16 %v968_v38  ;;  %v969_v41 = vunpack.i.l.bf16 %v968_v38  ;;  %v975_v42 = vunpack.i.h.bf16 %v973_v39  ;;  %v974_v43 = vunpack.i.l.bf16 %v973_v39 }
  0x9a   : > { %v287_v44 = vsel %vm284_vm3, %v224_v33, %v268_v36  ;;  %v288_v47 = vsel %vm284_vm3, %v223_v32, %v269_v37 }
  0x9b   : > { %v237_v50 = vsel %vm236_vm6, %v969_v41, %v970_v40  ;;  %v238_v51 = vsel %vm236_vm6, %v970_v40, %v969_v41  ;;  %v251_v52 = vsel %vm250_vm7, %v974_v43, %v975_v42  ;;  %v252_v53 = vsel %vm250_vm7, %v975_v42, %v974_v43 }
  0x9c   : > { %v274_v54 = vrot.slane %v237_v50, 4  ;;  %v275_v55 = vrot.slane %v238_v51, 4  ;;  %v280_v56 = vrot.slane %v251_v52, 4  ;;  %v281_v57 = vrot.slane %v252_v53, 4  ;;  %v978_v58 = vpop.permute.xlu0 %977  ;;  %v983_v59 = vpop.permute.xlu1 %982 }
  0x9d   : > { %v980_v60 = vunpack.i.h.bf16 %v978_v58  ;;  %v979_v61 = vunpack.i.l.bf16 %v978_v58  ;;  %v305_v62 = vmul.f32 %v295_v45, %v287_v44  ;;  %v306_v63 = vmul.f32 %v296_v48, %v288_v47  ;;  %v1243_v44 = vld [vmem:[%s1399_s3] ss:$0 sm:$0xff] }
  0x9e   : > { %v985_v4 = vunpack.i.h.bf16 %v983_v59  ;;  %v984_v5 = vunpack.i.l.bf16 %v983_v59  ;;  %v289_v6 = vsel %vm284_vm3, %v1140_v1, %v274_v54  ;;  %v290_v8 = vsel %vm284_vm3, %v1144_v2, %v275_v55  ;;  %v301_v1 = vld [vmem:[%s1397_s1 + $0x40] sm:$0xf] }
  0x9f   : > { %v244_v11 = vsel %vm243_vm8, %v979_v61, %v980_v60  ;;  %v245_v12 = vsel %vm243_vm8, %v980_v60, %v979_v61  ;;  %v313_v13 = vpack.c.bf16 %v305_v62, %v303_v46  ;;  %v314_v14 = vpack.c.bf16 %v306_v63, %v304_v49 }
  0xa0   : > { %v291_v15 = vsel %vm284_vm3, %v244_v11, %v280_v56  ;;  %v307_v16 = vmul.f32 %v297_v0, %v289_v6  ;;  %v292_v2 = vsel %vm284_vm3, %v245_v12, %v281_v57  ;;  %v308_v17 = vmul.f32 %v298_v3, %v290_v8 }
  0xa1   : > { %331 = vxpose.xlu0.c.b16.start [1/3] (short) %v313_v13, 128  ;;  %347 = vxpose.xlu1.c.b16.start [1/3] (short) %v314_v14, 128  ;;  %v309_v19 = vmul.f32 %v299_v7, %v291_v15  ;;  %v310_v20 = vmul.f32 %v300_v10, %v292_v2  ;;  %v258_v21 = vsel %vm257_vm9, %v984_v5, %v985_v4 }
  0xa2   : > { %v311_v22 = vmul.f32 %v301_v1, %v258_v21  ;;  %v259_v23 = vsel %vm257_vm9, %v985_v4, %v984_v5 }
  0xa3   : > { %v315_v24 = vpack.c.bf16 %v309_v19, %v307_v16  ;;  %v316_v25 = vpack.c.bf16 %v310_v20, %v308_v17  ;;  %v312_v26 = vmul.f32 %v302_v18, %v259_v23 }
  0xa4   : > { %v317_v27 = vpack.c.bf16 %v311_v22, %v311_v22 }
  0xa5   : > { %332 = vxpose.xlu0.c.b16.cont [2/3] (short) %v315_v24, 128  ;;  %348 = vxpose.xlu1.c.b16.cont [2/3] (short) %v316_v25, 128  ;;  %v318_v28 = vpack.c.bf16 %v312_v26, %v312_v26 }
  0xa9   : > { %333 = vxpose.xlu0.c.b16.end [3/3] (short) %v317_v27, 128  ;;  %349 = vxpose.xlu1.c.b16.end [3/3] (short) %v318_v28, 128 }
 0x103   : > { %v339_v29 = vpop.trf.xlu0  ;;  %v355_v30 = vpop.trf.xlu1 }
 0x104   : > { %856 = vmatprep.mubr.msk.bf16.mxu0 %vm378_vm10, %v339_v29  ;;  %872 = vmatprep.mubr.msk.bf16.mxu1 %vm378_vm10, %v355_v30 }
 0x107   : > { %v340_v31 = vpop.trf.xlu0  ;;  %v356_v32 = vpop.trf.xlu1 }
 0x108   : > { %857 = vmatmul.mubr.msk.bf16.vlgmr.msra.gmra.mxu0 %vm378_vm10, %v340_v31  ;;  %873 = vmatmul.mubr.msk.bf16.vlgmr.msra.gmra.mxu1 %vm378_vm10, %v356_v32 }
 0x10b   : > { %v341_v9 = vpop.trf.xlu0  ;;  %v357_v33 = vpop.trf.xlu1 }
 0x10c   : > { %860 = vmatprep.mubr.msk.bf16.mxu0 %vm378_vm10, %v341_v9  ;;  %876 = vmatprep.mubr.msk.bf16.mxu1 %vm378_vm10, %v357_v33 }
 0x10f   : > { %v342_v34 = vpop.trf.xlu0  ;;  %v358_v35 = vpop.trf.xlu1 }
 0x110   : > { %861 = vmatmul.mubr.msk.bf16.gmra.mxu0 %vm378_vm10, %v342_v34  ;;  %877 = vmatmul.mubr.msk.bf16.gmra.mxu1 %vm378_vm10, %v358_v35 }
 0x113   : > { %v343_v36 = vpop.trf.xlu0  ;;  %v359_v37 = vpop.trf.xlu1 }
 0x114   : > { %864 = vmatprep.mubr.msk.bf16.mxu0 %vm378_vm10, %v343_v36  ;;  %880 = vmatprep.mubr.msk.bf16.mxu1 %vm378_vm10, %v359_v37 }
 0x117   : > { %v344_v38 = vpop.trf.xlu0  ;;  %v360_v39 = vpop.trf.xlu1 }
 0x118   : > { %865 = vmatmul.mubr.msk.bf16.gmra.mxu0 %vm378_vm10, %v344_v38  ;;  %881 = vmatmul.mubr.msk.bf16.gmra.mxu1 %vm378_vm10, %v360_v39 }
 0x11b   : > { %v345_v40 = vpop.trf.xlu0  ;;  %v361_v41 = vpop.trf.xlu1 }
 0x11c   : > { %868 = vmatprep.mubr.msk.bf16.mxu0 %vm378_vm10, %v345_v40  ;;  %884 = vmatprep.mubr.msk.bf16.mxu1 %vm378_vm10, %v361_v41 }
 0x11f   : > { %v346_v42 = vpop.trf.xlu0  ;;  %v362_v43 = vpop.trf.xlu1 }
 0x120   : > { %869 = vmatmul.mubr.msk.bf16.gmra.mxu0 %vm378_vm10, %v346_v42  ;;  %885 = vmatmul.mubr.msk.bf16.gmra.mxu1 %vm378_vm10, %v362_v43 }
 0x1c8   : > { %v858_v45 = vpop.f32.mrf.mxu0  ;;  %v874_v46 = vpop.f32.mrf.mxu1 }
 0x1c9   : > { %v474_v47 = vadd.f32 %v858_v45, %v1243_v44  ;;  %v538_v48 = vadd.f32 %v874_v46, %v1243_v44 }
 0x1ca   : > { %v465_v49 = vpop.f32.mrf.mxu0  ;;  %v529_v50 = vpop.f32.mrf.mxu1 }
 0x1cb   : > { %vm594_vm12 = vcmp.ge.f32.partialorder %v474_v47, 0.0  ;;  %v626_v51 = vmul.f32 0.01, %v474_v47  ;;  %vm610_vm13 = vcmp.ge.f32.partialorder %v538_v48, 0.0  ;;  %v642_v52 = vmul.f32 0.01, %v538_v48 }
 0x1cc   : > { %v466_v53 = vadd.f32 %v1243_v44, %v465_v49  ;;  %v530_v54 = vadd.f32 %v1243_v44, %v529_v50  ;;  %v859_v55 = vpop.f32.mrf.mxu0  ;;  %v875_v56 = vpop.f32.mrf.mxu1 }
 0x1cd   : > { %v658_v57 = vsel %vm594_vm12, %v474_v47, %v626_v51  ;;  %v674_v58 = vsel %vm610_vm13, %v538_v48, %v642_v52  ;;  %v477_v59 = vadd.f32 %v859_v55, %v1243_v44  ;;  %v541_v60 = vadd.f32 %v875_v56, %v1243_v44 }
 0x1ce   : > { %691 = vst.msk [vmem:[%s1253_s10 + $0x10] sm:$0xff] %vm688_vm11, %v658_v57  ;;  %707 = vst.msk [vmem:[%s1253_s10 + $0x90] sm:$0xff] %vm688_vm11, %v674_v58  ;;  %vm592_vm14 = vcmp.ge.f32.partialorder %v466_v53, 0.0  ;;  %v624_v61 = vmul.f32 0.01, %v466_v53  ;;  %vm608_vm15 = vcmp.ge.f32.partialorder %v530_v54, 0.0  ;;  %v468_v63 = vpop.f32.mrf.mxu0  ;;  %v532_v0 = vpop.f32.mrf.mxu1 }
 0x1cf   : > { %v640_v62 = vmul.f32 0.01, %v530_v54  ;;  %vm595_vm0 = vcmp.ge.f32.partialorder %v477_v59, 0.0  ;;  %v627_v3 = vmul.f32 0.01, %v477_v59  ;;  %vm611_vm1 = vcmp.ge.f32.partialorder %v541_v60, 0.0 }
 0x1d0   : > { %v643_v4 = vmul.f32 0.01, %v541_v60  ;;  %v656_v5 = vsel %vm592_vm14, %v466_v53, %v624_v61  ;;  %v469_v7 = vadd.f32 %v1243_v44, %v468_v63  ;;  %v533_v8 = vadd.f32 %v1243_v44, %v532_v0  ;;  %v862_v10 = vpop.f32.mrf.mxu0  ;;  %v878_v11 = vpop.f32.mrf.mxu1 }
 0x1d1   : > { %v672_v6 = vsel %vm608_vm15, %v530_v54, %v640_v62  ;;  %689 = vst.msk [vmem:[%s1253_s10] sm:$0xff] %vm688_vm11, %v656_v5  ;;  %v659_v12 = vsel %vm595_vm0, %v477_v59, %v627_v3  ;;  %v490_v14 = vadd.f32 %v862_v10, %v1243_v44  ;;  %v554_v1 = vadd.f32 %v878_v11, %v1243_v44 }
 0x1d2   : > { %705 = vst.msk [vmem:[%s1253_s10 + $0x80] sm:$0xff] %vm688_vm11, %v672_v6  ;;  %v675_v13 = vsel %vm611_vm1, %v541_v60, %v643_v4  ;;  %692 = vst.msk [vmem:[%s1253_s10 + $0x18] sm:$0xff] %vm688_vm11, %v659_v12  ;;  %vm593_vm2 = vcmp.ge.f32.partialorder %v469_v7, 0.0  ;;  %v625_v15 = vmul.f32 0.01, %v469_v7  ;;  %vm609_vm3 = vcmp.ge.f32.partialorder %v533_v8, 0.0  ;;  %v481_v2 = vpop.f32.mrf.mxu0  ;;  %v545_v17 = vpop.f32.mrf.mxu1 }
 0x1d3   : > { %708 = vst.msk [vmem:[%s1253_s10 + $0x98] sm:$0xff] %vm688_vm11, %v675_v13  ;;  %v641_v16 = vmul.f32 0.01, %v533_v8  ;;  %vm598_vm4 = vcmp.ge.f32.partialorder %v490_v14, 0.0  ;;  %v630_v18 = vmul.f32 0.01, %v490_v14  ;;  %v482_v22 = vadd.f32 %v1243_v44, %v481_v2 }
 0x1d4   : > { %vm614_vm5 = vcmp.ge.f32.partialorder %v554_v1, 0.0  ;;  %v646_v19 = vmul.f32 0.01, %v554_v1  ;;  %v657_v20 = vsel %vm593_vm2, %v469_v7, %v625_v15  ;;  %v546_v23 = vadd.f32 %v1243_v44, %v545_v17  ;;  %v863_v24 = vpop.f32.mrf.mxu0  ;;  %v879_v25 = vpop.f32.mrf.mxu1 }
 0x1d5   : > { %v673_v21 = vsel %vm609_vm3, %v533_v8, %v641_v16  ;;  %690 = vst.msk [vmem:[%s1253_s10 + $0x8] sm:$0xff] %vm688_vm11, %v657_v20  ;;  %v662_v26 = vsel %vm598_vm4, %v490_v14, %v630_v18  ;;  %v493_v28 = vadd.f32 %v863_v24, %v1243_v44  ;;  %v557_v29 = vadd.f32 %v879_v25, %v1243_v44 }
 0x1d6   : > { %706 = vst.msk [vmem:[%s1253_s10 + $0x88] sm:$0xff] %vm688_vm11, %v673_v21  ;;  %v678_v27 = vsel %vm614_vm5, %v554_v1, %v646_v19  ;;  %695 = vst.msk [vmem:[%s1253_s10 + $0x30] sm:$0xff] %vm688_vm11, %v662_v26  ;;  %vm596_vm6 = vcmp.ge.f32.partialorder %v482_v22, 0.0  ;;  %v628_v30 = vmul.f32 0.01, %v482_v22  ;;  %vm612_vm7 = vcmp.ge.f32.partialorder %v546_v23, 0.0  ;;  %v484_v32 = vpop.f32.mrf.mxu0  ;;  %v548_v9 = vpop.f32.mrf.mxu1 }
 0x1d7   : > { %711 = vst.msk [vmem:[%s1253_s10 + $0xb0] sm:$0xff] %vm688_vm11, %v678_v27  ;;  %v644_v31 = vmul.f32 0.01, %v546_v23  ;;  %vm599_vm8 = vcmp.ge.f32.partialorder %v493_v28, 0.0  ;;  %v631_v33 = vmul.f32 0.01, %v493_v28  ;;  %v485_v37 = vadd.f32 %v1243_v44, %v484_v32 }
 0x1d8   : > { %vm615_vm9 = vcmp.ge.f32.partialorder %v557_v29, 0.0  ;;  %v647_v34 = vmul.f32 0.01, %v557_v29  ;;  %v660_v35 = vsel %vm596_vm6, %v482_v22, %v628_v30  ;;  %v549_v38 = vadd.f32 %v1243_v44, %v548_v9  ;;  %v866_v39 = vpop.f32.mrf.mxu0  ;;  %v882_v40 = vpop.f32.mrf.mxu1 }
 0x1d9   : > { %v676_v36 = vsel %vm612_vm7, %v546_v23, %v644_v31  ;;  %693 = vst.msk [vmem:[%s1253_s10 + $0x20] sm:$0xff] %vm688_vm11, %v660_v35  ;;  %v663_v41 = vsel %vm599_vm8, %v493_v28, %v631_v33  ;;  %v506_v43 = vadd.f32 %v866_v39, %v1243_v44  ;;  %v570_v45 = vadd.f32 %v882_v40, %v1243_v44 }
 0x1da   : > { %709 = vst.msk [vmem:[%s1253_s10 + $0xa0] sm:$0xff] %vm688_vm11, %v676_v36  ;;  %v679_v42 = vsel %vm615_vm9, %v557_v29, %v647_v34  ;;  %696 = vst.msk [vmem:[%s1253_s10 + $0x38] sm:$0xff] %vm688_vm11, %v663_v41  ;;  %vm597_vm10 = vcmp.ge.f32.partialorder %v485_v37, 0.0  ;;  %v629_v46 = vmul.f32 0.01, %v485_v37  ;;  %vm613_vm12 = vcmp.ge.f32.partialorder %v549_v38, 0.0  ;;  %v497_v48 = vpop.f32.mrf.mxu0  ;;  %v561_v49 = vpop.f32.mrf.mxu1 }
 0x1db   : > { %712 = vst.msk [vmem:[%s1253_s10 + $0xb8] sm:$0xff] %vm688_vm11, %v679_v42  ;;  %v645_v47 = vmul.f32 0.01, %v549_v38  ;;  %vm602_vm13 = vcmp.ge.f32.partialorder %v506_v43, 0.0  ;;  %v634_v50 = vmul.f32 0.01, %v506_v43  ;;  %v498_v54 = vadd.f32 %v1243_v44, %v497_v48 }
 0x1dc   : > { %vm618_vm14 = vcmp.ge.f32.partialorder %v570_v45, 0.0  ;;  %v650_v51 = vmul.f32 0.01, %v570_v45  ;;  %v661_v52 = vsel %vm597_vm10, %v485_v37, %v629_v46  ;;  %v562_v55 = vadd.f32 %v1243_v44, %v561_v49  ;;  %v867_v56 = vpop.f32.mrf.mxu0  ;;  %v883_v57 = vpop.f32.mrf.mxu1 }
 0x1dd   : > { %v677_v53 = vsel %vm613_vm12, %v549_v38, %v645_v47  ;;  %694 = vst.msk [vmem:[%s1253_s10 + $0x28] sm:$0xff] %vm688_vm11, %v661_v52  ;;  %v666_v58 = vsel %vm602_vm13, %v506_v43, %v634_v50  ;;  %v509_v60 = vadd.f32 %v867_v56, %v1243_v44  ;;  %v573_v61 = vadd.f32 %v883_v57, %v1243_v44 }
 0x1de   : > { %710 = vst.msk [vmem:[%s1253_s10 + $0xa8] sm:$0xff] %vm688_vm11, %v677_v53  ;;  %v682_v59 = vsel %vm618_vm14, %v570_v45, %v650_v51  ;;  %699 = vst.msk [vmem:[%s1253_s10 + $0x50] sm:$0xff] %vm688_vm11, %v666_v58  ;;  %vm600_vm15 = vcmp.ge.f32.partialorder %v498_v54, 0.0  ;;  %v632_v62 = vmul.f32 0.01, %v498_v54  ;;  %vm616_vm0 = vcmp.ge.f32.partialorder %v562_v55, 0.0  ;;  %v500_v0 = vpop.f32.mrf.mxu0  ;;  %v564_v3 = vpop.f32.mrf.mxu1 }
 0x1df   : > { %715 = vst.msk [vmem:[%s1253_s10 + $0xd0] sm:$0xff] %vm688_vm11, %v682_v59  ;;  %v648_v63 = vmul.f32 0.01, %v562_v55  ;;  %vm603_vm1 = vcmp.ge.f32.partialorder %v509_v60, 0.0  ;;  %v635_v4 = vmul.f32 0.01, %v509_v60  ;;  %v501_v8 = vadd.f32 %v1243_v44, %v500_v0 }
 0x1e0   : > { %vm619_vm2 = vcmp.ge.f32.partialorder %v573_v61, 0.0  ;;  %v651_v5 = vmul.f32 0.01, %v573_v61  ;;  %v664_v6 = vsel %vm600_vm15, %v498_v54, %v632_v62  ;;  %v565_v10 = vadd.f32 %v1243_v44, %v564_v3  ;;  %v870_v11 = vpop.f32.mrf.mxu0  ;;  %v886_v12 = vpop.f32.mrf.mxu1 }
 0x1e1   : > { %v680_v7 = vsel %vm616_vm0, %v562_v55, %v648_v63  ;;  %697 = vst.msk [vmem:[%s1253_s10 + $0x40] sm:$0xff] %vm688_vm11, %v664_v6  ;;  %v667_v13 = vsel %vm603_vm1, %v509_v60, %v635_v4  ;;  %v522_v1 = vadd.f32 %v870_v11, %v1243_v44  ;;  %v586_v15 = vadd.f32 %v886_v12, %v1243_v44 }
 0x1e2   : > { %713 = vst.msk [vmem:[%s1253_s10 + $0xc0] sm:$0xff] %vm688_vm11, %v680_v7  ;;  %v683_v14 = vsel %vm619_vm2, %v573_v61, %v651_v5  ;;  %700 = vst.msk [vmem:[%s1253_s10 + $0x58] sm:$0xff] %vm688_vm11, %v667_v13  ;;  %vm601_vm3 = vcmp.ge.f32.partialorder %v501_v8, 0.0  ;;  %v633_v16 = vmul.f32 0.01, %v501_v8  ;;  %vm617_vm4 = vcmp.ge.f32.partialorder %v565_v10, 0.0  ;;  %v513_v17 = vpop.f32.mrf.mxu0  ;;  %v577_v18 = vpop.f32.mrf.mxu1 }
 0x1e3   : > { %716 = vst.msk [vmem:[%s1253_s10 + $0xd8] sm:$0xff] %vm688_vm11, %v683_v14  ;;  %v649_v2 = vmul.f32 0.01, %v565_v10  ;;  %vm606_vm5 = vcmp.ge.f32.partialorder %v522_v1, 0.0  ;;  %v638_v19 = vmul.f32 0.01, %v522_v1  ;;  %v514_v23 = vadd.f32 %v1243_v44, %v513_v17 }
 0x1e4   : > { %vm622_vm6 = vcmp.ge.f32.partialorder %v586_v15, 0.0  ;;  %v654_v20 = vmul.f32 0.01, %v586_v15  ;;  %v665_v21 = vsel %vm601_vm3, %v501_v8, %v633_v16  ;;  %v578_v24 = vadd.f32 %v1243_v44, %v577_v18  ;;  %v871_v25 = vpop.f32.mrf.mxu0  ;;  %v887_v26 = vpop.f32.mrf.mxu1 }
 0x1e5   : > { %v681_v22 = vsel %vm617_vm4, %v565_v10, %v649_v2  ;;  %698 = vst.msk [vmem:[%s1253_s10 + $0x48] sm:$0xff] %vm688_vm11, %v665_v21  ;;  %v670_v27 = vsel %vm606_vm5, %v522_v1, %v638_v19  ;;  %v525_v29 = vadd.f32 %v871_v25, %v1243_v44  ;;  %v589_v30 = vadd.f32 %v887_v26, %v1243_v44 }
 0x1e6   : > { %714 = vst.msk [vmem:[%s1253_s10 + $0xc8] sm:$0xff] %vm688_vm11, %v681_v22  ;;  %v686_v28 = vsel %vm622_vm6, %v586_v15, %v654_v20  ;;  %703 = vst.msk [vmem:[%s1253_s10 + $0x70] sm:$0xff] %vm688_vm11, %v670_v27  ;;  %vm604_vm7 = vcmp.ge.f32.partialorder %v514_v23, 0.0  ;;  %v636_v31 = vmul.f32 0.01, %v514_v23  ;;  %vm620_vm8 = vcmp.ge.f32.partialorder %v578_v24, 0.0  ;;  %v516_v9 = vpop.f32.mrf.mxu0  ;;  %v580_v33 = vpop.f32.mrf.mxu1 }
 0x1e7   : > { %719 = vst.msk [vmem:[%s1253_s10 + $0xf0] sm:$0xff] %vm688_vm11, %v686_v28  ;;  %v652_v32 = vmul.f32 0.01, %v578_v24  ;;  %vm607_vm9 = vcmp.ge.f32.partialorder %v525_v29, 0.0  ;;  %v639_v34 = vmul.f32 0.01, %v525_v29  ;;  %v517_v38 = vadd.f32 %v1243_v44, %v516_v9 }
 0x1e8   : > { %vm623_vm10 = vcmp.ge.f32.partialorder %v589_v30, 0.0  ;;  %v655_v35 = vmul.f32 0.01, %v589_v30  ;;  %v668_v36 = vsel %vm604_vm7, %v514_v23, %v636_v31  ;;  %v581_v39 = vadd.f32 %v1243_v44, %v580_v33 }
 0x1e9   : > { %v684_v37 = vsel %vm620_vm8, %v578_v24, %v652_v32  ;;  %701 = vst.msk [vmem:[%s1253_s10 + $0x60] sm:$0xff] %vm688_vm11, %v668_v36  ;;  %v671_v40 = vsel %vm607_vm9, %v525_v29, %v639_v34  ;;  %vm605_vm12 = vcmp.ge.f32.partialorder %v517_v38, 0.0  ;;  %v637_v42 = vmul.f32 0.01, %v517_v38 }
 0x1ea   : > { %717 = vst.msk [vmem:[%s1253_s10 + $0xe0] sm:$0xff] %vm688_vm11, %v684_v37  ;;  %v687_v41 = vsel %vm623_vm10, %v589_v30, %v655_v35  ;;  %704 = vst.msk [vmem:[%s1253_s10 + $0x78] sm:$0xff] %vm688_vm11, %v671_v40  ;;  %vm621_vm13 = vcmp.ge.f32.partialorder %v581_v39, 0.0  ;;  %v653_v43 = vmul.f32 0.01, %v581_v39 }
 0x1eb   : > { %720 = vst.msk [vmem:[%s1253_s10 + $0xf8] sm:$0xff] %vm688_vm11, %v687_v41  ;;  %v669_v44 = vsel %vm605_vm12, %v517_v38, %v637_v42 }
 0x1ec   : > { %v685_v45 = vsel %vm621_vm13, %v581_v39, %v653_v43  ;;  %702 = vst.msk [vmem:[%s1253_s10 + $0x68] sm:$0xff] %vm688_vm11, %v669_v44 }
 0x1ed   : > { %718 = vst.msk [vmem:[%s1253_s10 + $0xe8] sm:$0xff] %vm688_vm11, %v685_v45 }
 0x1ee   : > { %1002 = shalt.err (!%p999_p3)
}
 0x1ef   : > { %s1003_s29 = scalar_lea.hbm %s1346_s14, 4096  ;;  %s1007_s6 = scalar_lea.hbm %s1400_s4, 8192 }
 0x1f0   : > { %p1004_p4 = scmp.ne.s32.totalorder %s1346_s14, %s1003_s29  ;;  %p1008_p9 = scmp.lt.s32.totalorder %s1346_s14, %s1400_s4 }
 0x1f1   : > { %p1009_p10 = scmp.lt.s32.totalorder %s1007_s6, %s1003_s29 }
 0x1f2   : > { %p1005_p7 = pnand %p1004_p4, %p1125_p5 }
 0x1f3   : > { %p1010_p11 = por %p1009_p10, %p1008_p9 }
 0x1f4   : > { %p1006_p8 = pneg %p1005_p7 }
 0x1f6   : > { %p1011_p12 = pnand %p1010_p11, %p1006_p8 }
 0x1f8   : > { %1014 = shalt.err (!%p1011_p12)
}
 0x1f9   : > { %s1060_s9 = smov 128   ;;  %s1061_s10 = smov 8  }
 0x1fa   : > { %896 = dma.vmem_to_hbm [thread:$0]  (%p1125_p5), %s1348_s12, 4096, %s1346_s14, %s1356_s20, %s1060_s9, %s1060_s9, %s1061_s10  }
 0x1fb PF: > { %p902_p13 = scmp.ge.s32.totalorder %s1049_s18, 2  ;;  %s750_s11 = sand.u32 1, %s1037_s15  }
 0x1fc   : > { %s751_s19 = scalar_lea.sflag [#allocation3], %s750_s11 }
 0x1fd   : > { %p899_p0 = pnand %p902_p13, %p1129_p6 }
 0x1ff   : > { %p900_p1 = pneg %p899_p0 }
 0x201   : > { %1032 = dma.done.wait (%p900_p1), %s751_s19, 4096  }
 0x202   : > { %1034 = vsyncadd (%p900_p1), %s751_s19, 4294963200  ;;  %p14_p2 = scmp.ge.s32.totalorder %s1112_s21, 4   ;;  %s1403_s15 = smov %s1041_s16 }
 0x203   : > { %s1404_s16 = smov %s1045_s17  ;;  %s1405_s17 = smov %s1123_s24 }
 0x204   : > { %s1406_s18 = smov %s1112_s21  ;;  %16 = sbr.rel (!%p14_p2) target bundleno = 3 (0x3), region = 71 }
 0x209   :  { %756 = vsyncpa [#allocation3], 1 }
 0x20a   :  { %758 = vsyncpa [#allocation3 + $0x1], 1 }

</bundles_post_ra>
